<compile_context>
chip_gen: v7x
topology: tpu7x:2x2x1
jax: 0.10.0
libtpu: 0.0.40
codegen_flags: <defaults>
</compile_context>

<pallas_src>
import functools

import jax
import jax.numpy as jnp
from jax import lax
from jax.experimental import pallas as pl
from jax.experimental.pallas import tpu as pltpu

_LANE = 128
_MAX_TILE_B = 4096          # batch rows per grid step (multiple of 128)
_VMEM_LIMIT = 32 * 1024 * 1024


def _cwkl_sum(pt, ps, w, axis):
    """sum(weights * softmax(PT) * (log_softmax(PT) - log_softmax(PS))) over the
    whole tile; softmax/log-softmax taken over `axis` (the class axis)."""
    pt = pt.astype(jnp.float32)
    ps = ps.astype(jnp.float32)
    w = w.astype(jnp.float32)

    pt_shift = pt - jnp.max(pt, axis=axis, keepdims=True)
    ps_shift = ps - jnp.max(ps, axis=axis, keepdims=True)
    pt_e = jnp.exp(pt_shift)
    ps_e = jnp.exp(ps_shift)
    pt_sum = jnp.sum(pt_e, axis=axis, keepdims=True)
    ps_sum = jnp.sum(ps_e, axis=axis, keepdims=True)

    pt_sm = pt_e * pl.reciprocal(pt_sum, approx=False)   # softmax(PT)
    # log_softmax(PT) - log_softmax(PS)
    log_ratio = (pt_shift - ps_shift) - (jnp.log(pt_sum) - jnp.log(ps_sum))
    return jnp.sum(w * pt_sm * log_ratio)


def _cwkl_single_kernel(pt_ref, ps_ref, w_ref, out_ref):
    # Whole problem resident in VMEM, no grid.  Class axis is the last axis.
    total = _cwkl_sum(pt_ref[...], ps_ref[...], w_ref[...], axis=-1)
    out_ref[...] = jnp.full((8, _LANE), total, jnp.float32)


def _cwkl_tiled_kernel(pt_ref, ps_ref, w_ref, out_ref, *, b, tile_b, ragged):
    # Native (tile_b, C) block -> transpose in-kernel so batch is on the 128
    # lanes (full lane occupancy for the exp's) and the class reduction is a
    # sublane reduction.
    pt = jnp.transpose(pt_ref[...]).astype(jnp.float32)   # (C, tile_b)
    ps = jnp.transpose(ps_ref[...]).astype(jnp.float32)
    w = jnp.transpose(w_ref[...]).astype(jnp.float32)

    if ragged:  # trace-time: only emitted when B % tile_b != 0
        i = pl.program_id(0)
        col = lax.broadcasted_iota(jnp.int32, (1, tile_b), 1)
        valid = (i * tile_b + col) < b
        # Mask pt/ps too: the OOB rows of the last block are undefined and
        # could be Inf/NaN (0 * NaN = NaN), so zero weights alone are not enough.
        pt = jnp.where(valid, pt, 0.0)
        ps = jnp.where(valid, ps, 0.0)
        w = jnp.where(valid, w, 0.0)

    partial = _cwkl_sum(pt, ps, w, axis=0)
    # Independent per-tile partial (parallel-grid safe); reduced in the wrapper.
    out_ref[...] = jnp.full((1, 8, _LANE), partial, jnp.float32)


def cwkl_loss(pt, ps, weights):
    """weights * softmax(PT) * (log softmax(PT) - log softmax(PS)),
    summed over classes, averaged over the batch. Returns a scalar f32."""
    assert pt.shape == ps.shape == weights.shape and pt.ndim == 2
    b, c = pt.shape
    inv_b = jnp.float32(1.0 / b)
    itemsize = int(jnp.dtype(pt.dtype).itemsize)

    if b <= _MAX_TILE_B:
        # Small problem: single invocation, no grid (no per-step overhead).
        out = pl.pallas_call(
            _cwkl_single_kernel,
            out_shape=jax.ShapeDtypeStruct((8, _LANE), jnp.float32),
            in_specs=[pl.BlockSpec(memory_space=pltpu.MemorySpace.VMEM)] * 3,
            out_specs=pl.BlockSpec(memory_space=pltpu.MemorySpace.VMEM),
            compiler_params=pltpu.CompilerParams(vmem_limit_bytes=_VMEM_LIMIT),
            cost_estimate=pl.CostEstimate(
                flops=12 * b * c,
                transcendentals=2 * b * c + 4 * b,
                bytes_accessed=3 * b * c * itemsize + 8 * _LANE * 4),
        )(pt, ps, weights)
        return out[0, 0] * inv_b

    tile_b = _MAX_TILE_B
    num_tiles = (b + tile_b - 1) // tile_b
    ragged = (b % tile_b) != 0

    kernel = functools.partial(
        _cwkl_tiled_kernel, b=b, tile_b=tile_b, ragged=ragged)
    in_spec = pl.BlockSpec((tile_b, c), lambda i: (i, 0))

    partials = pl.pallas_call(
        kernel,
        out_shape=jax.ShapeDtypeStruct((num_tiles, 8, _LANE), jnp.float32),
        grid=(num_tiles,),
        in_specs=[in_spec, in_spec, in_spec],
        out_specs=pl.BlockSpec((1, 8, _LANE), lambda i: (i, 0, 0)),
        compiler_params=pltpu.CompilerParams(
            dimension_semantics=("parallel",),
            vmem_limit_bytes=_VMEM_LIMIT),
        cost_estimate=pl.CostEstimate(
            flops=12 * num_tiles * tile_b * c,
            transcendentals=2 * num_tiles * tile_b * c + 4 * num_tiles * tile_b,
            bytes_accessed=3 * b * c * itemsize + num_tiles * 8 * _LANE * 4),
    )(pt, ps, weights)

    # f32 wrapper-side reduction of the per-tile partials, then 1/B once.
    return jnp.sum(partials[:, 0, 0]) * inv_b


def _reference(pt, ps, weights):
    pt_sm = jax.nn.softmax(pt.astype(jnp.float32), axis=1)
    ps_sm = jax.nn.softmax(ps.astype(jnp.float32), axis=1)
    cwkl = weights * pt_sm * (jnp.log(pt_sm + 1e-10) - jnp.log(ps_sm + 1e-10))
    return cwkl.sum(axis=1).mean()


if __name__ == "__main__":
    keys = jax.random.split(jax.random.PRNGKey(0), 6)

    # Small case (PyTorch convention: (batch_size, num_classes)).
    batch, num_classes = 8, 32
    PT = jax.random.normal(keys[0], (batch, num_classes), dtype=jnp.float32)
    PS = jax.random.normal(keys[1], (batch, num_classes), dtype=jnp.float32)
    W = jax.random.uniform(keys[2], (batch, num_classes), dtype=jnp.float32)

    loss = cwkl_loss(PT, PS, W)
    jax.block_until_ready(loss)
    ref = _reference(PT, PS, W)
    jax.block_until_ready(ref)
    assert jnp.allclose(loss, ref, rtol=1e-4, atol=1e-5), (loss, ref)

    # Larger batch: exercises the tiled path (grid=3, ragged last tile with
    # in-kernel masking, per-tile partial sums + parallel grid).
    big_b = 9000
    PT2 = jax.random.normal(keys[3], (big_b, num_classes), dtype=jnp.float32)
    PS2 = jax.random.normal(keys[4], (big_b, num_classes), dtype=jnp.float32)
    W2 = jax.random.uniform(keys[5], (big_b, num_classes), dtype=jnp.float32)

    loss2 = cwkl_loss(PT2, PS2, W2)
    jax.block_until_ready(loss2)
    ref2 = _reference(PT2, PS2, W2)
    jax.block_until_ready(ref2)
    assert jnp.allclose(loss2, ref2, rtol=1e-4, atol=1e-5), (loss2, ref2)

    print("KERNEL_OK")
</pallas_src>

<mosaic_0001>
module attributes {stable_mosaic.version = 11 : i64} {
  func.func @_cwkl_single_kernel(%arg0: memref<8x32xf32, #tpu.memory_space<vmem>>, %arg1: memref<8x32xf32, #tpu.memory_space<vmem>>, %arg2: memref<8x32xf32, #tpu.memory_space<vmem>>, %arg3: memref<8x128xf32, #tpu.memory_space<vmem>>) attributes {dimension_semantics = [], scalar_prefetch = 0 : i64, scratch_operands = 0 : i64, tpu.core_type = #tpu.core_type<tc>} {
    %c0 = arith.constant 0 : index
    %c0_0 = arith.constant 0 : index
    %0 = vector.load %arg0[%c0, %c0_0] : memref<8x32xf32, #tpu.memory_space<vmem>>, vector<8x32xf32>
    %c0_1 = arith.constant 0 : index
    %c0_2 = arith.constant 0 : index
    %1 = vector.load %arg1[%c0_1, %c0_2] : memref<8x32xf32, #tpu.memory_space<vmem>>, vector<8x32xf32>
    %c0_3 = arith.constant 0 : index
    %c0_4 = arith.constant 0 : index
    %2 = vector.load %arg2[%c0_3, %c0_4] : memref<8x32xf32, #tpu.memory_space<vmem>>, vector<8x32xf32>
    %cst = arith.constant dense<0xFF800000> : vector<8xf32>
    %3 = vector.multi_reduction <maximumf>, %0, %cst [1] : vector<8x32xf32> to vector<8xf32>
    %4 = vector.shape_cast %3 : vector<8xf32> to vector<8x1xf32>
    %5 = vector.broadcast %4 : vector<8x1xf32> to vector<8x32xf32>
    %6 = arith.subf %0, %5 : vector<8x32xf32>
    %cst_5 = arith.constant dense<0xFF800000> : vector<8xf32>
    %7 = vector.multi_reduction <maximumf>, %1, %cst_5 [1] : vector<8x32xf32> to vector<8xf32>
    %8 = vector.shape_cast %7 : vector<8xf32> to vector<8x1xf32>
    %9 = vector.broadcast %8 : vector<8x1xf32> to vector<8x32xf32>
    %10 = arith.subf %1, %9 : vector<8x32xf32>
    %11 = math.exp %6 : vector<8x32xf32>
    %12 = math.exp %10 : vector<8x32xf32>
    %cst_6 = arith.constant dense<0.000000e+00> : vector<8xf32>
    %13 = vector.multi_reduction <add>, %11, %cst_6 [1] : vector<8x32xf32> to vector<8xf32>
    %14 = vector.shape_cast %13 : vector<8xf32> to vector<8x1xf32>
    %cst_7 = arith.constant dense<0.000000e+00> : vector<8xf32>
    %15 = vector.multi_reduction <add>, %12, %cst_7 [1] : vector<8x32xf32> to vector<8xf32>
    %16 = vector.shape_cast %15 : vector<8xf32> to vector<8x1xf32>
    %17 = tpu.reciprocal %14 : vector<8x1xf32> -> vector<8x1xf32>
    %18 = vector.broadcast %17 : vector<8x1xf32> to vector<8x32xf32>
    %19 = arith.mulf %11, %18 : vector<8x32xf32>
    %20 = arith.subf %6, %10 : vector<8x32xf32>
    %21 = math.log %14 : vector<8x1xf32>
    %22 = math.log %16 : vector<8x1xf32>
    %23 = arith.subf %21, %22 : vector<8x1xf32>
    %24 = vector.broadcast %23 : vector<8x1xf32> to vector<8x32xf32>
    %25 = arith.subf %20, %24 : vector<8x32xf32>
    %26 = arith.mulf %2, %19 : vector<8x32xf32>
    %27 = arith.mulf %26, %25 : vector<8x32xf32>
    %28 = vector.shape_cast %27 : vector<8x32xf32> to vector<1x8x32xf32>
    %cst_8 = arith.constant dense<0.000000e+00> : vector<1xf32>
    %29 = vector.multi_reduction <add>, %28, %cst_8 [1, 2] : vector<1x8x32xf32> to vector<1xf32>
    %30 = vector.shape_cast %29 : vector<1xf32> to vector<1x1x1xf32>
    %31 = vector.extract %30[0, 0, 0] : f32 from vector<1x1x1xf32>
    %32 = vector.broadcast %31 : f32 to vector<8x128xf32>
    %c0_9 = arith.constant 0 : index
    %c0_10 = arith.constant 0 : index
    %33 = vector.load %arg3[%c0_9, %c0_10] : memref<8x128xf32, #tpu.memory_space<vmem>>, vector<8x128xf32>
    tpu.vector_store %arg3[%c0_9, %c0_10], %32 {strides = array<i32>} : memref<8x128xf32, #tpu.memory_space<vmem>>, vector<8x128xf32>,
    return
  }
}

</mosaic_0001>

<bundles_post_ra>
// kernel: tpu_custom_call.1
= control target key start
LH: loop header
LB: loop body
LE: loop exit
PB: predicated region body
PF: predicated region fallthrough
CT: control target
= control target key end

     0   :  { %8 = vsyncpa [#allocation3], 0  ;;  %s298_s0 = inlined_call_operand.hbm [shape: f32[8,32], index: 0, kind: input, shape index: {}]   ;;  %s299_s1 = inlined_call_operand.hbm [shape: f32[8,32], index: 1, kind: input, shape index: {}]   ;;  %s300_s2 = inlined_call_operand.hbm [shape: f32[8,32], index: 2, kind: input, shape index: {}]   ;;  %s301_s3 = inlined_call_operand.hbm [shape: f32[8,128], index: 3, kind: output, shape index: {}]  }
   0x1   :  { %9 = vsyncpa [#allocation6], 0 }
   0x2   :  { %10 = vsyncpa [#allocation4], 0  ;;  %s221_s12 = smov [#allocation5]   ;;  %s222_s14 = smov [#allocation2]  }
   0x3   :  { %s27_s13 = sshll.u32 %s221_s12, 4  ;;  %s17_s15 = sshll.u32 %s222_s14, 4  ;;  %s28_s13 = int_to_ptr.vmem [resolvable:$true] %s27_s13  ;;  %s18_s15 = int_to_ptr.vmem [resolvable:$true] %s17_s15 }
   0x4   :  { %s127_s18 = scalar_lea.hbm %s299_s1, 128 }
   0x5   :  { %p128_p0 = scmp.ne.s32.totalorder %s299_s1, %s127_s18  ;;  %p131_p1 = scmp.lt.u32.totalorder %s127_s18, %s299_s1 }
   0x7   :  { %p133_p2 = pnand %p131_p1, %p128_p0 }
   0x9   :  { %136 = shalt.err (!%p133_p2)
}
   0xa   :  { %s137_s23 = scalar_lea.vmem %s28_s13, 128  ;;  %p142_p4 = scmp.lt.s32.totalorder %s28_s13, %s28_s13 }
   0xb   :  { %p138_p3 = scmp.ne.s32.totalorder %s28_s13, %s137_s23  ;;  %p143_p5 = scmp.lt.s32.totalorder %s137_s23, %s137_s23 }
   0xd   :  { %p144_p6 = por %p143_p5, %p142_p4 }
   0xf   :  { %p145_p7 = pnand %p144_p6, %p138_p3 }
  0x11   :  { %148 = shalt.err (!%p145_p7)
}
  0x12   :  { %30 = dma.hbm_to_vmem [thread:$0]  %s299_s1, 128, %s28_s13, [#allocation6]  }
  0x13   :  { %s149_s28 = scalar_lea.hbm %s298_s0, 128 }
  0x14   :  { %p150_p8 = scmp.ne.s32.totalorder %s298_s0, %s149_s28  ;;  %p153_p9 = scmp.lt.u32.totalorder %s149_s28, %s298_s0 }
  0x16   :  { %p155_p10 = pnand %p153_p9, %p150_p8 }
  0x18   :  { %158 = shalt.err (!%p155_p10)
}
  0x19   :  { %s159_s6 = scalar_lea.vmem %s18_s15, 128  ;;  %p164_p12 = scmp.lt.s32.totalorder %s18_s15, %s18_s15 }
  0x1a   :  { %p160_p11 = scmp.ne.s32.totalorder %s18_s15, %s159_s6  ;;  %p165_p13 = scmp.lt.s32.totalorder %s159_s6, %s159_s6 }
  0x1c   :  { %p166_p0 = por %p165_p13, %p164_p12 }
  0x1e   :  { %p167_p1 = pnand %p166_p0, %p160_p11 }
  0x20   :  { %170 = shalt.err (!%p167_p1)
}
  0x21   :  { %20 = dma.hbm_to_vmem [thread:$0]  %s298_s0, 128, %s18_s15, [#allocation3]  }
  0x22   :  { %s223_s8 = smov [#allocation7]   ;;  %s171_s12 = scalar_lea.hbm %s300_s2, 128 }
  0x23   :  { %s37_s9 = sshll.u32 %s223_s8, 4  ;;  %p172_p2 = scmp.ne.s32.totalorder %s300_s2, %s171_s12  ;;  %s38_s9 = int_to_ptr.vmem [resolvable:$true] %s37_s9 }
  0x24   :  { %p175_p3 = scmp.lt.u32.totalorder %s171_s12, %s300_s2 }
  0x26   :  { %p177_p4 = pnand %p175_p3, %p172_p2 }
  0x28   :  { %180 = shalt.err (!%p177_p4)
}
  0x29   :  { %s181_s18 = scalar_lea.vmem %s38_s9, 128  ;;  %p186_p6 = scmp.lt.s32.totalorder %s38_s9, %s38_s9 }
  0x2a   :  { %p182_p5 = scmp.ne.s32.totalorder %s38_s9, %s181_s18  ;;  %p187_p7 = scmp.lt.s32.totalorder %s181_s18, %s181_s18 }
  0x2c   :  { %p188_p8 = por %p187_p7, %p186_p6 }
  0x2e   :  { %p189_p9 = pnand %p188_p8, %p182_p5 }
  0x30   :  { %192 = shalt.err (!%p189_p9)
}
  0x31   :  { %40 = dma.hbm_to_vmem [thread:$0]  %s300_s2, 128, %s38_s9, [#allocation6]  }
  0x32   :  { %215 = dma.done.wait [#allocation3], 128  }
  0x33   :  { %216 = vsyncadd [#allocation3], 4294967168 }
  0x34   :  { %217 = dma.done.wait [#allocation6], 256  }
  0x35   :  { %218 = vsyncadd [#allocation6], 4294967040  ;;  %vm53_vm0 = vcmask 261120   ;;  %v50_v0 = vld [vmem:[#allocation2] sm:$0xff]  ;;  %v51_v1 = vld [vmem:[#allocation5] sm:$0xff]  ;;  %s224_s2 = smov [#allocation8]  }
  0x36   :  { %v54_v2 = vsel %vm53_vm0, %v50_v0, -inf  ;;  %v58_v3 = vsel %vm53_vm0, %v51_v1, -inf  ;;  %v52_v23 = vld [vmem:[#allocation7] sm:$0xff]  ;;  %s101_s19 = sshll.u32 %s224_s2, 4  ;;  %s102_s19 = int_to_ptr.vmem [resolvable:$true] %s101_s19 }
  0x37   :  { %55 = vmax.xlane.f32.xlu0 %v54_v2  ;;  %s193_s21 = scalar_lea.vmem %s102_s19, 128  ;;  %p198_p11 = scmp.lt.s32.totalorder %s102_s19, %s102_s19 }
  0x38   :  { %p194_p10 = scmp.ne.s32.totalorder %s102_s19, %s193_s21  ;;  %p199_p12 = scmp.lt.s32.totalorder %s193_s21, %s193_s21 }
  0x3a   :  { %p200_p13 = por %p199_p12, %p198_p11 }
  0x3b   :  { %59 = vmax.xlane.f32.xlu0 %v58_v3 }
  0x3c   :  { %p201_p0 = pnand %p200_p13, %p194_p10 }
  0xc4   :  { %v56_v4 = vpop.xlane.xlu0 %55 }
  0xc5   :  { %v57_v5 = vsub.f32 %v50_v0, %v56_v4 }
  0xc7   :  { %v62_v6 = vmul.f32 1.442695, %v57_v5 }
  0xc8   :  { %v60_v7 = vpop.xlane.xlu0 %59 }
  0xc9   :  { %117 = vpow2.f32 %v62_v6  ;;  %v61_v8 = vsub.f32 %v51_v1, %v60_v7 }
  0xcb   :  { %v64_v9 = vmul.f32 1.442695, %v61_v8  ;;  %v74_v10 = vsub.f32 %v57_v5, %v61_v8 }
  0xcd   :  { %119 = vpow2.f32 %v64_v9 }
  0xd3   :  { %v118_v11 = vpop.eup %117 }
  0xd4   :  { %v66_v12 = vsel %vm53_vm0, %v118_v11, 0.0 }
  0xd5   :  { %67 = vadd.xlane.f32.xlu1 %v66_v12 }
  0xd7   :  { %v120_v13 = vpop.eup %119 }
  0xd8   :  { %v69_v14 = vsel %vm53_vm0, %v120_v13, 0.0 }
  0xd9   :  { %70 = vadd.xlane.f32.xlu1 %v69_v14 }
 0x162   :  { %v68_v15 = vpop.xlane.xlu1 %67 }
 0x163   :  { %121 = vrcp.f32 %v68_v15 }
 0x164   :  { %123 = vlog2.f32 %v68_v15 }
 0x166   :  { %v71_v16 = vpop.xlane.xlu1 %70 }
 0x167   :  { %125 = vlog2.f32 %v71_v16 }
 0x16d   :  { %v122_v17 = vpop.eup %121 }
 0x16e   :  { %v124_v18 = vpop.eup %123  ;;  %v73_v22 = vmul.f32 %v122_v17, %v118_v11 }
 0x16f   :  { %v76_v20 = vmul.f32 0.6931472, %v124_v18 }
 0x170   :  { %v81_v26 = vmul.f32 %v73_v22, %v52_v23 }
 0x171   :  { %v126_v19 = vpop.eup %125 }
 0x172   :  { %v78_v21 = vmul.f32 0.6931472, %v126_v19 }
 0x174   :  { %v79_v24 = vsub.f32 %v76_v20, %v78_v21 }
 0x176   :  { %v80_v25 = vsub.f32 %v74_v10, %v79_v24 }
 0x178   :  { %v82_v27 = vmul.f32 %v81_v26, %v80_v25 }
 0x17a   :  { %v83_v28 = vsel %vm53_vm0, %v82_v27, 0.0 }
 0x17b   :  { %84 = vadd.xlane.f32.xlu0 %v83_v28 }
 0x208   :  { %v85_v29 = vpop.xlane.xlu0 %84 }
 0x209   :  { %v86_v30 = vrot.slane %v85_v29, 4 }
 0x20b   :  { %v87_v31 = vadd.f32 %v86_v30, %v85_v29 }
 0x20d   :  { %v88_v32 = vrot.slane %v87_v31, 2 }
 0x20f   :  { %v89_v33 = vadd.f32 %v88_v32, %v87_v31 }
 0x211   :  { %v90_v34 = vrot.slane %v89_v33, 1 }
 0x213   :  { %v91_v35 = vadd.f32 %v90_v34, %v89_v33 }
 0x215   :  { %111 = vpush %v91_v35 }
 0x246   :  { %s112_s20 = spop %111 }
 0x247   :  { %v93_v36 = vstv %s112_s20 }
 0x248   :  { %94 = vst [vmem:[#allocation8] sm:$0xff] %v93_v36 }
 0x249   :  { %204 = shalt.err (!%p201_p0)
}
 0x24a   :  { %s205_s24 = scalar_lea.hbm %s301_s3, 128 }
 0x24b   :  { %p206_p1 = scmp.ne.s32.totalorder %s301_s3, %s205_s24  ;;  %p209_p2 = scmp.lt.u32.totalorder %s205_s24, %s301_s3 }
 0x24d   :  { %p211_p3 = pnand %p209_p2, %p206_p1 }
 0x24f   :  { %214 = shalt.err (!%p211_p3)
}
 0x250   :  { %104 = dma.vmem_to_hbm [thread:$0]  %s102_s19, 128, %s301_s3, [#allocation4]  }
 0x251   :  { %219 = dma.done.wait [#allocation4], 128  }
 0x252   :  { %220 = vsyncadd [#allocation4], 4294967168 }
 0x253   :  { %108 = vsyncpa [#allocation3], 1 }
 0x254   :  { %109 = vsyncpa [#allocation6], 1 }
 0x255   :  { %110 = vsyncpa [#allocation4], 1 }

</bundles_post_ra>
